<compile_context>
chip_gen: v5e
topology: v5e:2x2
jax: 0.10.0
libtpu: 0.0.40
codegen_flags: <defaults>
</compile_context>

<pallas_src>
import functools

import jax
import jax.numpy as jnp
from jax.experimental import pallas as pl
from jax.experimental.pallas import tpu as pltpu


def _log_kernel(x_ref, o_ref):
    # Pure elementwise natural log on the whole VMEM tile (EUP path).
    o_ref[...] = jnp.log(x_ref[...])


_LANE_CANDIDATES = (8192, 4096, 2048, 1024, 512, 256, 128)
_TARGET_BLOCK_ELEMS = 1 << 20  # ~1M f32 elements -> 4 MiB per block


def _choose_layout(n):
    """Pick (cols, padded_n) so padded_n % cols == 0, preferring no padding."""
    for cols in _LANE_CANDIDATES:
        if n >= cols and n % cols == 0:
            return cols, n  # zero-copy path: no pad, no slice
    # Ragged length: pad at small granularity (<= 4 KiB of f32 waste).
    cols = 1024 if n >= 1024 else 128
    return cols, pl.cdiv(n, cols) * cols


@jax.jit
def pallas_log(x):
    """Elementwise torch.log(input) equivalent for arbitrary shapes."""
    orig_shape = x.shape
    orig_dtype = x.dtype

    # torch.log promotes integer/bool inputs to floating point.
    out_dtype = orig_dtype if jnp.issubdtype(orig_dtype, jnp.floating) else jnp.float32
    xf = x.astype(jnp.float32)  # compute in f32 (no bf16 EUP on v5e)

    flat = xf.reshape(-1)
    n = flat.shape[0]
    if n == 0:
        return jnp.zeros(orig_shape, out_dtype)

    cols, n_pad = _choose_layout(n)
    if n_pad != n:
        # Pad with 1.0 so log() of padding stays finite (discarded afterwards).
        flat = jnp.concatenate(
            [flat, jnp.ones((n_pad - n,), dtype=flat.dtype)], axis=0
        )

    rows = n_pad // cols
    x2d = flat.reshape(rows, cols)

    # ~4 MiB f32 blocks, tiled only over rows (last dim kept full => lane-dense).
    tile_rows = max(1, _TARGET_BLOCK_ELEMS // cols)
    if tile_rows >= rows:
        tile_rows = rows  # block == full array dims: always legal
    else:
        tile_rows = max(8, (tile_rows // 8) * 8)  # sublane-aligned

    grid = (pl.cdiv(rows, tile_rows),)  # ragged last block is masked by Pallas

    out2d = pl.pallas_call(
        _log_kernel,
        out_shape=jax.ShapeDtypeStruct((rows, cols), jnp.float32),
        grid_spec=pltpu.PrefetchScalarGridSpec(
            num_scalar_prefetch=0,
            grid=grid,
            in_specs=[pl.BlockSpec((tile_rows, cols), lambda i: (i, 0))],
            out_specs=pl.BlockSpec((tile_rows, cols), lambda i: (i, 0)),
        ),
        compiler_params=pltpu.CompilerParams(
            dimension_semantics=("parallel",),  # lets v7x shard grid over 2 TCs
        ),
        cost_estimate=pl.CostEstimate(
            flops=0, transcendentals=n_pad, bytes_accessed=8 * n_pad
        ),
    )(x2d)

    out = out2d.reshape(-1)
    if n_pad != n:
        out = out[:n]
    return out.reshape(orig_shape).astype(out_dtype)


if __name__ == "__main__":
    key = jax.random.PRNGKey(0)
    # Small NCHW-like input, strictly positive so log is well-defined.
    x = jax.random.uniform(
        key, (2, 4, 16, 16), dtype=jnp.float32, minval=0.1, maxval=5.0
    )

    y = pallas_log(x)
    jax.block_until_ready(y)

    y_ref = jnp.log(x)
    assert y.shape == x.shape and y.dtype == x.dtype
    assert jnp.allclose(y, y_ref, rtol=1e-6, atol=1e-6), "mismatch vs jnp.log"

    print("KERNEL_OK")
</pallas_src>

<mosaic_0001>
module attributes {stable_mosaic.version = 11 : i64} {
  func.func @_log_kernel(%arg0: i32, %arg1: memref<1x2048xf32, #tpu.memory_space<vmem>>, %arg2: memref<1x2048xf32, #tpu.memory_space<vmem>>) attributes {dimension_semantics = [#tpu.dimension_semantics<parallel>], iteration_bounds = array<i64: 1>, scalar_prefetch = 0 : i64, scratch_operands = 0 : i64, tpu.core_type = #tpu.core_type<tc>, window_params = [{transform_indices = @transform_0, window_bounds = array<i64: 1, 2048>}, {transform_indices = @transform_1, window_bounds = array<i64: 1, 2048>}]} {
    %c0 = arith.constant 0 : index
    %c0_0 = arith.constant 0 : index
    %0 = vector.load %arg1[%c0, %c0_0] : memref<1x2048xf32, #tpu.memory_space<vmem>>, vector<1x2048xf32>
    %1 = math.log %0 : vector<1x2048xf32>
    %c0_1 = arith.constant 0 : index
    %c0_2 = arith.constant 0 : index
    %2 = vector.load %arg2[%c0_1, %c0_2] : memref<1x2048xf32, #tpu.memory_space<vmem>>, vector<1x2048xf32>
    tpu.vector_store %arg2[%c0_1, %c0_2], %1 {strides = array<i32>} : memref<1x2048xf32, #tpu.memory_space<vmem>>, vector<1x2048xf32>,
    return
  }
  func.func @transform_0(%arg0: i32) -> (i32, i32) {
    %c0_i32 = arith.constant 0 : i32
    %c0_i32_0 = arith.constant 0 : i32
    return %arg0, %c0_i32 : i32, i32
  }
  func.func @transform_1(%arg0: i32) -> (i32, i32) {
    %c0_i32 = arith.constant 0 : i32
    %c0_i32_0 = arith.constant 0 : i32
    return %arg0, %c0_i32 : i32, i32
  }
}

</mosaic_0001>

<bundles_post_ra>
// kernel: pallas_log.1
= control target key start
LH: loop header
LB: loop body
LE: loop exit
PB: predicated region body
PF: predicated region fallthrough
CT: control target
= control target key end

     0   :  { %s46_s0 = inlined_call_operand.vmem [shape: f32[1,2048], index: 0, kind: input, shape index: {}]   ;;  %s47_s1 = inlined_call_operand.vmem [shape: f32[1,2048], index: 1, kind: output, shape index: {}]  }
   0x1   :  { %v8_v0 = vld [vmem:[%s46_s0] sm:$0xff]  ;;  %v9_v1 = vld [vmem:[%s46_s0 + $0x8] sm:$0xff] }
   0x2   :  { %20 = vlog2.f32 %v8_v0 }
   0x3   :  { %22 = vlog2.f32 %v9_v1 }
   0x8   :  { %v21_v2 = vpop.eup %20 }
   0x9   :  { %v23_v3 = vpop.eup %22  ;;  %v11_v4 = vmul.f32 0.6931472, %v21_v2 }
   0xa   :  { %v13_v5 = vmul.f32 0.6931472, %v23_v3 }
   0xb   :  { %14 = vst [vmem:[%s47_s1] sm:$0xff] %v11_v4 }
   0xc   :  { %15 = vst [vmem:[%s47_s1 + $0x8] sm:$0xff] %v13_v5 }

</bundles_post_ra>
